<compile_context>
chip_gen: v7x
topology: tpu7x:2x2x1
jax: 0.10.0
libtpu: 0.0.40
codegen_flags: <defaults>
</compile_context>

<pallas_src>
import jax
import jax.numpy as jnp
from jax.experimental import pallas as pl
from jax.experimental.pallas import tpu as pltpu


def _round_up(x, m):
    return (x + m - 1) // m * m


def content_agg_kernel(e0_ref, e1_ref, e2_ref, w_ref, b_ref, out_ref):
    # Sum of the three content embeddings, accumulated in f32 on the VPU.
    x = (e0_ref[...].astype(jnp.float32)
         + e1_ref[...].astype(jnp.float32)
         + e2_ref[...].astype(jnp.float32))

    # F.normalize(p=2, dim=-1, eps=1e-12):
    #   x / max(||x||, eps) == x * rsqrt(max(||x||^2, eps^2))
    # rsqrt sits on the EUP slot -> hidden under the matmul / DMA.
    ss = jnp.sum(x * x, axis=-1, keepdims=True)
    x = x * jax.lax.rsqrt(jnp.maximum(ss, 1e-24))

    # fc: x @ W^T + b.  W is pre-transposed to [384, E]; cast the normalized
    # activations to the (bf16) weight dtype so the MXU runs its native path,
    # accumulating in f32.
    w = w_ref[...]
    h = jnp.dot(x.astype(w.dtype), w, preferred_element_type=jnp.float32)
    h = h + b_ref[...]

    # ReLU; F.dropout is identity in eval mode.
    # TODO(synk): training-mode dropout would need pltpu.prng_seed/prng_random_bits.
    out_ref[...] = jnp.maximum(h, 0.0).astype(out_ref.dtype)


def prepare_fc_params(w_fc, b_fc, *, weight_dtype=jnp.bfloat16):
    """One-time transform of the nn.Linear params (hoisted out of the hot path)."""
    w_t = jnp.transpose(w_fc).astype(weight_dtype)     # [384, E]
    b_2d = b_fc.reshape(1, -1).astype(jnp.float32)     # [1, E]
    return w_t, b_2d


def content_agg(e0, e1, e2, w_t, b_2d, *, block_rows=None):
    """Content_Agg forward (eval mode).

    e0, e1, e2 : [N, 384] content embeddings.  Pass bf16: the kernel is
                 HBM-read bound and upcasts to f32 internally, so bf16 halves
                 the dominant traffic at negligible accuracy cost.
    w_t, b_2d  : pre-transformed fc params from prepare_fc_params().
    returns    : [N, E] float32 == relu(normalize(e0+e1+e2) @ w_fc.T + b_fc)
    """
    N, D = e0.shape
    E = w_t.shape[1]

    if block_rows is None:
        # Bigger row blocks amortize the ~0.35 us per-grid-step overhead; bf16
        # inputs allow doubling the block at the same VMEM footprint.
        block_rows = 2048 if e0.dtype.itemsize <= 2 else 1024

    # Row-block size: multiple of 8 (sublane axis).  No host-side padding of
    # the inputs -- Pallas masks the ragged edge block.
    tm_full = _round_up(N, 8)
    tm = min(_round_up(block_rows, 8), tm_full)
    if tm == tm_full and N > 8:
        # Keep at least 2 row blocks so the "parallel" axis can actually be
        # split across v7x's two TensorCores.
        tm = _round_up(pl.cdiv(N, 2), 8)
    grid = (pl.cdiv(N, tm),)

    in_bytes = e0.dtype.itemsize
    # Double-buffered inputs + output, plus the (double-buffered but tiny)
    # resident fc params.
    vmem_need = (3 * 2 * tm * D * in_bytes
                 + 2 * tm * E * 4
                 + 2 * (D * E * w_t.dtype.itemsize + E * 4))
    vmem_limit = None
    if vmem_need > 12 * 2**20:   # beyond v5e's 16 MiB default scoped VMEM
        vmem_limit = min(int(vmem_need * 3 // 2), 64 * 2**20)

    cost = pl.CostEstimate(
        flops=2 * N * D * E + 5 * N * D,
        transcendentals=N,
        bytes_accessed=(3 * N * D * in_bytes + N * E * 4
                        + D * E * w_t.dtype.itemsize + E * 4),
    )

    return pl.pallas_call(
        content_agg_kernel,
        out_shape=jax.ShapeDtypeStruct((N, E), jnp.float32),
        grid=grid,
        in_specs=[
            pl.BlockSpec((tm, D), lambda i: (i, 0)),   # e0 row block
            pl.BlockSpec((tm, D), lambda i: (i, 0)),   # e1 row block
            pl.BlockSpec((tm, D), lambda i: (i, 0)),   # e2 row block
            pl.BlockSpec((D, E), lambda i: (0, 0)),    # fc weight (resident)
            pl.BlockSpec((1, E), lambda i: (0, 0)),    # fc bias   (resident)
        ],
        out_specs=pl.BlockSpec((tm, E), lambda i: (i, 0)),
        compiler_params=pltpu.CompilerParams(
            dimension_semantics=("parallel",),  # shard row blocks across TCs
            vmem_limit_bytes=vmem_limit,
        ),
        cost_estimate=cost,
    )(e0, e1, e2, w_t, b_2d)


if __name__ == "__main__":
    key = jax.random.PRNGKey(0)
    # N deliberately not a multiple of the row block (exercises the masked
    # edge block); content dim is hardwired to 384 by the module.
    N, D, E = 203, 384, 64

    k0, k1, k2, kw, kb = jax.random.split(key, 5)
    # bf16 embeddings: the kernel is HBM-read bound, bf16 halves that traffic.
    e0 = jax.random.normal(k0, (N, D), jnp.float32).astype(jnp.bfloat16)
    e1 = jax.random.normal(k1, (N, D), jnp.float32).astype(jnp.bfloat16)
    e2 = jax.random.normal(k2, (N, D), jnp.float32).astype(jnp.bfloat16)

    # nn.Linear(384, E) default init: U(-1/sqrt(384), 1/sqrt(384)).
    bound = 1.0 / (D ** 0.5)
    w_fc = jax.random.uniform(kw, (E, D), jnp.float32, -bound, bound)
    b_fc = jax.random.uniform(kb, (E,), jnp.float32, -bound, bound)

    # One-time parameter transform, hoisted out of the per-call path.
    w_t, b_2d = prepare_fc_params(w_fc, b_fc)

    out = content_agg(e0, e1, e2, w_t, b_2d)
    jax.block_until_ready(out)

    # Pure-JAX reference (same bf16 inputs, f32 math; dropout identity in eval).
    s = (e0.astype(jnp.float32) + e1.astype(jnp.float32)
         + e2.astype(jnp.float32))
    s = s / jnp.maximum(jnp.sqrt(jnp.sum(s * s, axis=-1, keepdims=True)), 1e-12)
    ref = jnp.maximum(s @ w_fc.T + b_fc, 0.0)

    assert out.shape == (N, E)
    # bf16 weight / bf16 MXU inputs inside the kernel -> loosen tolerance vs
    # the f32 reference (expected quantization, not a kernel bug).
    assert jnp.allclose(out, ref, atol=1e-2, rtol=1e-2), float(
        jnp.max(jnp.abs(out - ref)))
    print("KERNEL_OK")
</pallas_src>

<mosaic_0001>
module attributes {stable_mosaic.version = 11 : i64} {
  func.func @content_agg_kernel(%arg0: i32, %arg1: memref<104x384xbf16, #tpu.memory_space<vmem>>, %arg2: memref<104x384xbf16, #tpu.memory_space<vmem>>, %arg3: memref<104x384xbf16, #tpu.memory_space<vmem>>, %arg4: memref<384x64xbf16, #tpu.memory_space<vmem>>, %arg5: memref<1x64xf32, #tpu.memory_space<vmem>>, %arg6: memref<104x64xf32, #tpu.memory_space<vmem>>) attributes {dimension_semantics = [#tpu.dimension_semantics<parallel>], iteration_bounds = array<i64: 2>, scalar_prefetch = 0 : i64, scratch_operands = 0 : i64, tpu.core_type = #tpu.core_type<tc>, window_params = [{transform_indices = @transform_0, window_bounds = array<i64: 104, 384>}, {transform_indices = @transform_1, window_bounds = array<i64: 104, 384>}, {transform_indices = @transform_2, window_bounds = array<i64: 104, 384>}, {pipeline_mode = #tpu.pipeline_mode<synchronous>, transform_indices = @transform_3, window_bounds = array<i64: 384, 64>}, {pipeline_mode = #tpu.pipeline_mode<synchronous>, transform_indices = @transform_4, window_bounds = array<i64: 1, 64>}, {transform_indices = @transform_5, window_bounds = array<i64: 104, 64>}]} {
    %c0 = arith.constant 0 : index
    %c0_0 = arith.constant 0 : index
    %0 = vector.load %arg1[%c0, %c0_0] : memref<104x384xbf16, #tpu.memory_space<vmem>>, vector<104x384xbf16>
    %1 = arith.extf %0 : vector<104x384xbf16> to vector<104x384xf32>
    %c0_1 = arith.constant 0 : index
    %c0_2 = arith.constant 0 : index
    %2 = vector.load %arg2[%c0_1, %c0_2] : memref<104x384xbf16, #tpu.memory_space<vmem>>, vector<104x384xbf16>
    %3 = arith.extf %2 : vector<104x384xbf16> to vector<104x384xf32>
    %4 = arith.addf %1, %3 : vector<104x384xf32>
    %c0_3 = arith.constant 0 : index
    %c0_4 = arith.constant 0 : index
    %5 = vector.load %arg3[%c0_3, %c0_4] : memref<104x384xbf16, #tpu.memory_space<vmem>>, vector<104x384xbf16>
    %6 = arith.extf %5 : vector<104x384xbf16> to vector<104x384xf32>
    %7 = arith.addf %4, %6 : vector<104x384xf32>
    %8 = arith.mulf %7, %7 : vector<104x384xf32>
    %cst = arith.constant dense<0.000000e+00> : vector<104xf32>
    %9 = vector.multi_reduction <add>, %8, %cst [1] : vector<104x384xf32> to vector<104xf32>
    %10 = vector.shape_cast %9 : vector<104xf32> to vector<104x1xf32>
    %cst_5 = arith.constant 1.000000e-24 : f32
    %11 = vector.broadcast %cst_5 : f32 to vector<104x1xf32>
    %12 = arith.maximumf %10, %11 : vector<104x1xf32>
    %13 = math.rsqrt %12 : vector<104x1xf32>
    %14 = vector.broadcast %13 : vector<104x1xf32> to vector<104x384xf32>
    %15 = arith.mulf %7, %14 : vector<104x384xf32>
    %c0_6 = arith.constant 0 : index
    %c0_7 = arith.constant 0 : index
    %16 = vector.load %arg4[%c0_6, %c0_7] : memref<384x64xbf16, #tpu.memory_space<vmem>>, vector<384x64xbf16>
    %17 = arith.truncf %15 : vector<104x384xf32> to vector<104x384xbf16>
    %cst_8 = arith.constant dense<0.000000e+00> : vector<104x64xf32>
    %18 = tpu.matmul %17, %16, %cst_8 {dimension_numbers = #tpu.dot_dimension_numbers<[1], [0], [0], [1], [0, 0, 1, 1], [], []>} : vector<104x384xbf16>, vector<384x64xbf16>, vector<104x64xf32> -> vector<104x64xf32>
    %c0_9 = arith.constant 0 : index
    %c0_10 = arith.constant 0 : index
    %19 = vector.load %arg5[%c0_9, %c0_10] : memref<1x64xf32, #tpu.memory_space<vmem>>, vector<1x64xf32>
    %20 = vector.broadcast %19 : vector<1x64xf32> to vector<104x64xf32>
    %21 = arith.addf %18, %20 : vector<104x64xf32>
    %cst_11 = arith.constant 0.000000e+00 : f32
    %22 = vector.broadcast %cst_11 : f32 to vector<104x64xf32>
    %23 = arith.maximumf %21, %22 : vector<104x64xf32>
    %c0_12 = arith.constant 0 : index
    %c0_13 = arith.constant 0 : index
    %24 = vector.load %arg6[%c0_12, %c0_13] : memref<104x64xf32, #tpu.memory_space<vmem>>, vector<104x64xf32>
    tpu.vector_store %arg6[%c0_12, %c0_13], %23 {strides = array<i32>} : memref<104x64xf32, #tpu.memory_space<vmem>>, vector<104x64xf32>,
    return
  }
  func.func @transform_0(%arg0: i32) -> (i32, i32) {
    %c0_i32 = arith.constant 0 : i32
    %c0_i32_0 = arith.constant 0 : i32
    return %arg0, %c0_i32 : i32, i32
  }
  func.func @transform_1(%arg0: i32) -> (i32, i32) {
    %c0_i32 = arith.constant 0 : i32
    %c0_i32_0 = arith.constant 0 : i32
    return %arg0, %c0_i32 : i32, i32
  }
  func.func @transform_2(%arg0: i32) -> (i32, i32) {
    %c0_i32 = arith.constant 0 : i32
    %c0_i32_0 = arith.constant 0 : i32
    return %arg0, %c0_i32 : i32, i32
  }
  func.func @transform_3(%arg0: i32) -> (i32, i32) {
    %c0_i32 = arith.constant 0 : i32
    %c0_i32_0 = arith.constant 0 : i32
    %c0_i32_1 = arith.constant 0 : i32
    return %c0_i32, %c0_i32_0 : i32, i32
  }
  func.func @transform_4(%arg0: i32) -> (i32, i32) {
    %c0_i32 = arith.constant 0 : i32
    %c0_i32_0 = arith.constant 0 : i32
    %c0_i32_1 = arith.constant 0 : i32
    return %c0_i32, %c0_i32_0 : i32, i32
  }
  func.func @transform_5(%arg0: i32) -> (i32, i32) {
    %c0_i32 = arith.constant 0 : i32
    %c0_i32_0 = arith.constant 0 : i32
    return %arg0, %c0_i32 : i32, i32
  }
}

</mosaic_0001>

<bundles_post_ra>
// kernel: tpu_custom_call.1
= control target key start
LH: loop header
LB: loop body
LE: loop exit
PB: predicated region body
PF: predicated region fallthrough
CT: control target
= control target key end

     0   :  { %10 = vsyncpa [#allocation3], 0  ;;  %s2374_s0 = inlined_call_operand.hbm [shape: bf16[203,384], index: 0, kind: input, shape index: {}]   ;;  %s2375_s1 = inlined_call_operand.hbm [shape: bf16[203,384], index: 1, kind: input, shape index: {}]   ;;  %s2376_s2 = inlined_call_operand.hbm [shape: bf16[203,384], index: 2, kind: input, shape index: {}]   ;;  %s2377_s3 = inlined_call_operand.vmem [shape: bf16[384,64], index: 3, kind: input, shape index: {}]   ;;  %s2378_s4 = inlined_call_operand.vmem [shape: f32[1,64], index: 4, kind: input, shape index: {}]   ;;  %s2379_s5 = inlined_call_operand.vmem [shape: f32[203,64], index: 5, kind: output, shape index: {}]  }
   0x1   :  { %12 = vsyncpa [#allocation3 + $0x1], 0 }
   0x2   :  { %13 = vsyncpa [#allocation5], 0 }
   0x3   :  { %15 = vsyncpa [#allocation5 + $0x1], 0  ;;  %s1725_s18 = smov 0   ;;  %s1727_s19 = smov 0  }
   0x4   :  { %s1729_s20 = smov 0   ;;  %s1731_s21 = smov 0  }
   0x5 LB: > { %s1744_s22 = sadd.s32 4294967295, %s1686_s21   ;;  %s1747_s23 = sadd.s32 1, %s1686_s21   ;;  %s1686_s21 = sphi %s1731_s21, %s2391_s21   ;;  %s1682_s20 = sphi %s1729_s20, %s2390_s20   ;;  %s1678_s19 = sphi %s1727_s19, %s2389_s19   ;;  %s1674_s18 = sphi %s1725_s18, %s2388_s18  }
   0x6   : > { %s25_s24 = ssub.s32 %s1686_s21, %s1747_s23  ;;  %s28_s25 = sadd.s32 1, %s1682_s20 }
   0x7   : > { %p26_p0 = scmp.eq.s32.totalorder %s25_s24, 0  ;;  %p35_p1 = scmp.ne.s32.totalorder %s1682_s20, %s1678_s19 }
   0x8   : > { %p36_p2 = scmp.eq.s32.totalorder %s1686_s21, 0  ;;  %p41_p3 = scmp.ne.s32.totalorder %s1678_s19, %s1674_s18 }
   0x9   : > { %s1757_s26 = scalar_select %p26_p0, %s1682_s20, %s28_s25  }
   0xa   : > { %p37_p4 = por %p36_p2, %p35_p1  ;;  %p42_p5 = scmp.eq.s32.totalorder %s1744_s22, 0 }
   0xb   : > { %p1468_p6 = scmp.lt.s32.totalorder %s1686_s21, 2  ;;  %s191_s28 = sand.u32 1, %s1682_s20  }
   0xc   : > { %p1761_p7 = por %p42_p5, %p41_p3  ;;  %s1768_s29 = smul.u32 156, %s191_s28 }
   0xd   : > { %p1770_p8 = pnand %p1468_p6, %p37_p4  ;;  %s1775_s6 = smul.u32 2496, %s1686_s21 }
   0xe   : > { %s2381_s27 = scalar_select %p1761_p7, 1, 0 }
   0xf   : > { %s213_s7 = sand.u32 1, %s1686_s21   ;;  %s1782_s10 = scalar_lea.hbm %s2375_s1, %s1775_s6 }
  0x10   : > { %s217_s11 = scalar_lea.vmem [#allocation4], %s1768_s29  ;;  %s1788_s13 = scalar_lea.sflag [#allocation5], %s213_s7 }
  0x11   : > { %s225_s12 = sshll.u32 %s217_s11, 4  ;;  %s1558_s14 = scalar_lea.hbm %s1782_s10, 2496  ;;  %s1785_s12 = int_to_ptr.vmem [resolvable:$true] %s225_s12 }
  0x12   : > { %p1559_p10 = scmp.ne.s32.totalorder %s1782_s10, %s1558_s14  ;;  %p1794_p11 = pneg %p1770_p8 }
  0x13   : > { %s1563_s18 = scalar_lea.hbm %s2375_s1, 4992  ;;  %p1564_p0 = scmp.lt.u32.totalorder %s1782_s10, %s2375_s1 }
  0x14   : > { %p1561_p12 = pnand %p1794_p11, %p1559_p10  ;;  %p1565_p1 = scmp.lt.u32.totalorder %s1563_s18, %s1558_s14 }
  0x15   : > { %p1567_p3 = scmp.lt.u32.totalorder %s1558_s14, %s1782_s10 }
  0x16   : > { %p1562_p13 = pneg %p1561_p12  ;;  %p1566_p2 = por %p1565_p1, %p1564_p0 }
  0x18   : > { %p1568_p4 = por %p1567_p3, %p1566_p2 }
  0x1a   : > { %p1569_p5 = pnand %p1568_p4, %p1562_p13 }
  0x1c   : > { %1572 = shalt.err (!%p1569_p5)
}
  0x1d   : > { %s1573_s7 = scalar_lea.vmem %s1785_s12, 2496  ;;  %s1688_s8 = smov [#allocation4]  }
  0x1e   : > { %p1574_p6 = scmp.ne.s32.totalorder %s1785_s12, %s1573_s7  ;;  %s1578_s9 = sshll.u32 %s1688_s8, 4  ;;  %s1579_s9 = int_to_ptr.vmem [resolvable:$false] %s1578_s9 }
  0x1f   : > { %s1580_s11 = scalar_lea.vmem %s1579_s9, 4992  ;;  %p1581_p9 = scmp.lt.s32.totalorder %s1785_s12, %s1579_s9 }
  0x20   : > { %p1576_p10 = pnand %p1574_p6, %p1794_p11  ;;  %p1582_p7 = scmp.lt.s32.totalorder %s1580_s11, %s1573_s7 }
  0x22   : > { %p1577_p12 = pneg %p1576_p10  ;;  %p1583_p0 = por %p1582_p7, %p1581_p9 }
  0x24   : > { %p1584_p1 = pnand %p1583_p0, %p1577_p12 }
  0x26   : > { %1587 = shalt.err (!%p1584_p1)
}
  0x27   : > { %s1689_s14 = smov 192   ;;  %s1690_s16 = smov 12  }
  0x28   : > { %1464 = dma.hbm_to_vmem [thread:$0]  (!%p1770_p8), %s1782_s10, 2496, %s1785_s12, %s1788_s13, %s1689_s14, %s1689_s14, %s1690_s16  }
  0x29   : > { %p255_p7 = scmp.lt.s32.totalorder %s1686_s21, 3  ;;  %s1826_s24 = scalar_lea.hbm %s2374_s0, %s1775_s6 }
  0x2a   : > { %p2384_p9 = scmp.ge.s32.totalorder %s1686_s21, 1  ;;  %s195_s7 = scalar_lea.vmem [#allocation2], %s1768_s29 }
  0x2b   : > { %s203_s8 = sshll.u32 %s195_s7, 4  ;;  %s1839_s10 = scalar_lea.sflag [#allocation3], %s191_s28  ;;  %s1835_s8 = int_to_ptr.vmem [resolvable:$true] %s203_s8 }
  0x2c   : > { %p1830_p13 = pnand %p2384_p9, %p255_p7  ;;  %s1588_s12 = scalar_lea.hbm %s1826_s24, 2496 }
  0x2d   : > { %p1589_p2 = scmp.ne.s32.totalorder %s1826_s24, %s1588_s12  ;;  %s1593_s11 = scalar_lea.hbm %s2374_s0, 4992 }
  0x2e   : > { %s2385_s25 = scalar_select %p1830_p13, 1, 0 }
  0x2f   : > { %p1591_p3 = pnand %p1589_p2, %p1794_p11  ;;  %p1594_p5 = scmp.lt.u32.totalorder %s1826_s24, %s2374_s0 }
  0x30   : > { %p1595_p6 = scmp.lt.u32.totalorder %s1593_s11, %s1588_s12  ;;  %p1597_p12 = scmp.lt.u32.totalorder %s1588_s12, %s1826_s24 }
  0x31   : > { %p1592_p4 = pneg %p1591_p3 }
  0x32   : > { %p1596_p10 = por %p1595_p6, %p1594_p5 }
  0x34   : > { %p1598_p0 = por %p1597_p12, %p1596_p10 }
  0x36   : > { %p1599_p1 = pnand %p1598_p0, %p1592_p4 }
  0x38   : > { %1602 = shalt.err (!%p1599_p1)
}
  0x39   : > { %s1603_s28 = scalar_lea.vmem %s1835_s8, 2496  ;;  %s1691_s7 = smov [#allocation2]  }
  0x3a   : > { %p1604_p7 = scmp.ne.s32.totalorder %s1835_s8, %s1603_s28  ;;  %s1608_s21 = sshll.u32 %s1691_s7, 4  ;;  %s1609_s21 = int_to_ptr.vmem [resolvable:$false] %s1608_s21 }
  0x3b   : > { %s1610_s9 = scalar_lea.vmem %s1609_s21, 4992  ;;  %p1611_p3 = scmp.lt.s32.totalorder %s1835_s8, %s1609_s21 }
  0x3c   : > { %p1606_p9 = pnand %p1604_p7, %p1794_p11  ;;  %p1612_p13 = scmp.lt.s32.totalorder %s1610_s9, %s1603_s28 }
  0x3e   : > { %p1607_p2 = pneg %p1606_p9  ;;  %p1613_p5 = por %p1612_p13, %p1611_p3 }
  0x40   : > { %p1614_p6 = pnand %p1613_p5, %p1607_p2 }
  0x42   : > { %1617 = shalt.err (!%p1614_p6)
}
  0x43   : > { %1461 = dma.hbm_to_vmem [thread:$0]  (!%p1770_p8), %s1826_s24, 2496, %s1835_s8, %s1839_s10, %s1689_s14, %s1689_s14, %s1690_s16  }
  0x44   : > { %s1870_s17 = scalar_lea.hbm %s2376_s2, %s1775_s6  ;;  %s239_s18 = scalar_lea.vmem [#allocation6], %s1768_s29 }
  0x45   : > { %s247_s28 = sshll.u32 %s239_s18, 4  ;;  %s1618_s7 = scalar_lea.hbm %s1870_s17, 2496  ;;  %s1873_s28 = int_to_ptr.vmem [resolvable:$true] %s247_s28 }
  0x46   : > { %p1619_p13 = scmp.ne.s32.totalorder %s1870_s17, %s1618_s7  ;;  %s1623_s8 = scalar_lea.hbm %s2376_s2, 4992 }
  0x47   : > { %p1624_p12 = scmp.lt.u32.totalorder %s1870_s17, %s2376_s2  ;;  %p1625_p0 = scmp.lt.u32.totalorder %s1623_s8, %s1618_s7 }
  0x48   : > { %p1621_p4 = pnand %p1619_p13, %p1794_p11  ;;  %p1627_p7 = scmp.lt.u32.totalorder %s1618_s7, %s1870_s17 }
  0x49   : > { %p1626_p1 = por %p1625_p0, %p1624_p12 }
  0x4a   : > { %p1622_p10 = pneg %p1621_p4 }
  0x4b   : > { %p1628_p9 = por %p1627_p7, %p1626_p1 }
  0x4d   : > { %p1629_p2 = pnand %p1628_p9, %p1622_p10 }
  0x4f   : > { %1632 = shalt.err (!%p1629_p2)
}
  0x50   : > { %s1633_s29 = scalar_lea.vmem %s1873_s28, 2496  ;;  %s1692_s9 = smov [#allocation6]  }
  0x51   : > { %p1634_p3 = scmp.ne.s32.totalorder %s1873_s28, %s1633_s29  ;;  %s1638_s12 = sshll.u32 %s1692_s9, 4  ;;  %s1639_s12 = int_to_ptr.vmem [resolvable:$false] %s1638_s12 }
  0x52   : > { %s1640_s11 = scalar_lea.vmem %s1639_s12, 4992  ;;  %p1641_p13 = scmp.lt.s32.totalorder %s1873_s28, %s1639_s12 }
  0x53   : > { %p1636_p5 = pnand %p1634_p3, %p1794_p11  ;;  %p1642_p4 = scmp.lt.s32.totalorder %s1640_s11, %s1633_s29 }
  0x55   : > { %p1637_p6 = pneg %p1636_p5  ;;  %p1643_p12 = por %p1642_p4, %p1641_p13 }
  0x57   : > { %p1644_p0 = pnand %p1643_p12, %p1637_p6 }
  0x59   : > { %1647 = shalt.err (!%p1644_p0)
}
  0x5a   : > { %1467 = dma.hbm_to_vmem [thread:$0]  (!%p1770_p8), %s1870_s17, 2496, %s1873_s28, %s1788_s13, %s1689_s14, %s1689_s14, %s1690_s16  }
  0x5b   : > { %p2386_p11 = scmp.ne.s32.totalorder %s2385_s25, 0 }
  0x5c   : > { %s261_s15 = sand.u32 (!%p2386_p11), 1, %s1678_s19   ;;  %p2387_p10 = scmp.ne.s32.totalorder (!%p2386_p11), %s2381_s27, 0 }
  0x5d   : > { %259 = sbr.rel (%p2386_p11) target bundleno = 561 (0x231), region = 40  ;;  %s262_s7 = scalar_lea.sflag (!%p2386_p11), [#allocation3], %s261_s15 }
  0x5e   : > { %s1451_s18 = smul.u32 (!%p2386_p11), 156, %s261_s15 }
  0x60   : > { %s1903_s21 = scalar_lea.vmem (!%p2386_p11), [#allocation2], %s1451_s18 }
  0x64   : > { %1665 = dma.done.wait (%p2387_p10), %s262_s7, 2496  }
  0x65   : > { %1667 = vsyncadd (%p2387_p10), %s262_s7, 4294964800  ;;  %s270_s30 = sand.u32 1, %s1744_s22   ;;  %s1910_s13 = scalar_lea.vmem [#allocation4], %s1451_s18 }
  0x66   : > { %s271_s24 = scalar_lea.sflag [#allocation5], %s270_s30 }
  0x67   : > { %1669 = dma.done.wait (%p2387_p10), %s271_s24, 4992  }
  0x68   : > { %1671 = vsyncadd (%p2387_p10), %s271_s24, 4294962304  ;;  %v1693_v0 = vmov 0.0   ;;  %v330_v1 = vld [vmem:[%s1903_s21] sm:$0xff]  ;;  %v395_v3 = vld [vmem:[%s1910_s13] sm:$0xff]  ;;  %s1921_s14 = scalar_lea.vmem [#allocation6], %s1451_s18  ;;  %vm1694_vm0 = vmmov 0  }
  0x69   : > { %1401 = vmatprep.subr.bf16.mxu1 %v1693_v0  ;;  %v331_v2 = vld [vmem:[%s1903_s21 + $0x8] ss:$24 sps:$4 sm:$0xff]   ;;  %v356_v4 = vunpack.c.l.bf16 %v330_v1  ;;  %v357_v5 = vunpack.c.h.bf16 %v330_v1  ;;  %v421_v8 = vunpack.c.l.bf16 %v395_v3  ;;  %v499_v9 = vld [vmem:[%s1921_s14] sm:$0xff]  ;;  %v422_v11 = vunpack.c.h.bf16 %v395_v3  ;;  %v334_v15 = vld [vmem:[%s1903_s21 + $0x18] sm:$0xff]  ;;  %1417 = vmatprep.mubr.msk.bf16.mxu1 %vm1694_vm0, %v1693_v0 }
  0x6a   : > { %v358_v6 = vunpack.c.l.bf16 %v331_v2  ;;  %v396_v7 = vld [vmem:[%s1910_s13 + $0x8] ss:$24 sps:$4 sm:$0xff]   ;;  %v525_v13 = vunpack.c.l.bf16 %v499_v9  ;;  %v526_v14 = vunpack.c.h.bf16 %v499_v9  ;;  %v399_v16 = vld [vmem:[%s1910_s13 + $0x18] sm:$0xff]  ;;  %v503_v17 = vld [vmem:[%s1921_s14 + $0x18] sm:$0xff]  ;;  %v362_v20 = vunpack.c.l.bf16 %v334_v15 }
  0x6b   : > { %v500_v10 = vld [vmem:[%s1921_s14 + $0x8] ss:$24 sps:$4 sm:$0xff]   ;;  %v423_v12 = vunpack.c.l.bf16 %v396_v7  ;;  %v460_v18 = vadd.f32 %v421_v8, %v356_v4  ;;  %v363_v21 = vunpack.c.h.bf16 %v334_v15  ;;  %v461_v22 = vadd.f32 %v422_v11, %v357_v5  ;;  %v333_v35 = vld [vmem:[%s1903_s21 + $0x14] ss:$24 sps:$4 sm:$0xff]   ;;  %v397_v40 = vld [vmem:[%s1910_s13 + $0xc] sm:$0xff] }
  0x6c   : > { %v527_v19 = vunpack.c.l.bf16 %v500_v10  ;;  %v364_v24 = vunpack.c.h.bf16 %v331_v2  ;;  %v427_v25 = vunpack.c.l.bf16 %v399_v16  ;;  %v428_v27 = vunpack.c.h.bf16 %v399_v16  ;;  %v332_v30 = vld [vmem:[%s1903_s21 + $0xc] sm:$0xff]  ;;  %v501_v46 = vld [vmem:[%s1921_s14 + $0xc] sm:$0xff]  ;;  %v336_v56 = vld [vmem:[%s1903_s21 + $0x24] sm:$0xff] }
  0x6d   : > { %v462_v23 = vadd.f32 %v423_v12, %v358_v6  ;;  %v1928_v26 = vadd.f32 %v525_v13, %v460_v18  ;;  %v429_v28 = vunpack.c.h.bf16 %v396_v7  ;;  %v531_v29 = vunpack.c.l.bf16 %v503_v17  ;;  %v398_v45 = vld [vmem:[%s1910_s13 + $0x14] ss:$24 sps:$4 sm:$0xff]   ;;  %v401_v2 = vld [vmem:[%s1910_s13 + $0x24] sm:$0xff]  ;;  %v505_v7 = vld [vmem:[%s1921_s14 + $0x24] sm:$0xff] }
  0x6e   : > { %v1931_v31 = vadd.f32 %v526_v14, %v461_v22  ;;  %v466_v33 = vadd.f32 %v427_v25, %v362_v20  ;;  %v532_v34 = vunpack.c.h.bf16 %v503_v17  ;;  %v467_v37 = vadd.f32 %v428_v27, %v363_v21  ;;  %v502_v55 = vld [vmem:[%s1921_s14 + $0x14] ss:$24 sps:$4 sm:$0xff]   ;;  %v405_v27 = vld [vmem:[%s1910_s13 + $0x3c] sm:$0xff] }
  0x6f   : > { %v1933_v32 = vadd.f32 %v527_v19, %v462_v23  ;;  %v603_v36 = vmul.f32 %v1928_v26, %v1928_v26  ;;  %v468_v38 = vadd.f32 %v429_v28, %v364_v24  ;;  %v533_v39 = vunpack.c.h.bf16 %v500_v10  ;;  %v340_v16 = vld [vmem:[%s1903_s21 + $0x3c] sm:$0xff]  ;;  %v1973_v21 = vld [vmem:[%s1903_s21 + $0x38] ss:$12 sps:$4 sm:$0xff]  }
  0x70   : > { %v604_v41 = vmul.f32 %v1931_v31, %v1931_v31  ;;  %v1943_v43 = vadd.f32 %v531_v29, %v466_v33  ;;  %v359_v44 = vunpack.c.l.bf16 %v332_v30  ;;  %v1947_v47 = vadd.f32 %v532_v34, %v467_v37  ;;  %v1979_v34 = vld [vmem:[%s1910_s13 + $0x38] ss:$12 sps:$4 sm:$0xff]  }
  0x71   : > { %v605_v42 = vmul.f32 %v1933_v32, %v1933_v32  ;;  %v1949_v48 = vadd.f32 %v533_v39, %v468_v38  ;;  %v360_v49 = vunpack.c.h.bf16 %v332_v30  ;;  %v361_v50 = vunpack.c.l.bf16 %v333_v35 }
  0x72   : > { %v642_v51 = vadd.f32 %v604_v41, %v603_v36  ;;  %v609_v52 = vmul.f32 %v1943_v43, %v1943_v43  ;;  %v424_v53 = vunpack.c.l.bf16 %v397_v40  ;;  %v425_v54 = vunpack.c.h.bf16 %v397_v40  ;;  %v1988_v40 = vld [vmem:[%s1921_s14 + $0x38] ss:$12 sps:$4 sm:$0xff]  }
  0x73   : > { %v610_v57 = vmul.f32 %v1947_v47, %v1947_v47  ;;  %v611_v58 = vmul.f32 %v1949_v48, %v1949_v48  ;;  %v426_v59 = vunpack.c.l.bf16 %v398_v45  ;;  %v528_v60 = vunpack.c.l.bf16 %v501_v46  ;;  %v338_v41 = vld [vmem:[%s1903_s21 + $0x30] sm:$0xff] }
  0x74   : > { %v643_v61 = vadd.f32 %v642_v51, %v605_v42  ;;  %v463_v62 = vadd.f32 %v424_v53, %v359_v44  ;;  %v464_v63 = vadd.f32 %v425_v54, %v360_v49  ;;  %v529_v1 = vunpack.c.h.bf16 %v501_v46  ;;  %v403_v49 = vld [vmem:[%s1910_s13 + $0x30] sm:$0xff] }
  0x75   : > { %v650_v3 = vadd.f32 %v610_v57, %v609_v52  ;;  %v465_v4 = vadd.f32 %v426_v59, %v361_v50  ;;  %v530_v5 = vunpack.c.l.bf16 %v502_v55  ;;  %v365_v6 = vunpack.c.l.bf16 %v336_v56  ;;  %v1508_v50 = vld [vmem:[%s2377_s3 + $0x40] sm:$0xff]  }
  0x76   : > { %644 = vadd.xlane.f32.xlu0 %v643_v61  ;;  %v1961_v8 = vadd.f32 %v528_v60, %v463_v62  ;;  %v1963_v9 = vadd.f32 %v529_v1, %v464_v63  ;;  %v366_v10 = vunpack.c.h.bf16 %v336_v56  ;;  %v367_v11 = vunpack.c.h.bf16 %v333_v35  ;;  %v509_v35 = vld [vmem:[%s1921_s14 + $0x3c] sm:$0xff]  ;;  %v1509_v56 = vld [vmem:[%s2377_s3 + $0x80] sm:$0xff]   ;;  %1328 = vmatprep.subr.bf16.mxu0 %v1508_v50 }
  0x77   : > { %v651_v12 = vadd.f32 %v650_v3, %v611_v58  ;;  %v1965_v13 = vadd.f32 %v530_v5, %v465_v4  ;;  %v430_v14 = vunpack.c.l.bf16 %v401_v2  ;;  %v431_v15 = vunpack.c.h.bf16 %v401_v2  ;;  %v1510_v61 = vld [vmem:[%s2377_s3] sm:$0xff]   ;;  %v2013_v3 = vld [vmem:[%s1903_s21 + $0x54] sm:$0xff]  ;;  %1402 = vmatpush3.bf16.msra.mxu1 %v1509_v56  ;;  %v1511_v4 = vld [vmem:[%s2377_s3 + $0x48] sm:$0xff]  }
  0x78   : > { %v606_v17 = vmul.f32 %v1961_v8, %v1961_v8  ;;  %v607_v18 = vmul.f32 %v1963_v9, %v1963_v9  ;;  %v432_v19 = vunpack.c.h.bf16 %v398_v45  ;;  %v534_v20 = vunpack.c.l.bf16 %v505_v7  ;;  %1329 = vmatpush3.bf16.msra.mxu0 %v1510_v61  ;;  %1403 = vmatprep.subr.bf16.mxu1 %v1693_v0  ;;  %v407_v56 = vld [vmem:[%s1910_s13 + $0x48] sm:$0xff] }
  0x79   : > { %652 = vadd.xlane.f32.xlu1 %v651_v12  ;;  %v608_v22 = vmul.f32 %v1965_v13, %v1965_v13  ;;  %v469_v23 = vadd.f32 %v430_v14, %v365_v6  ;;  %v470_v24 = vadd.f32 %v431_v15, %v366_v10  ;;  %v535_v25 = vunpack.c.h.bf16 %v505_v7  ;;  %v1512_v12 = vld [vmem:[%s2377_s3 + $0x88] sm:$0xff]   ;;  %1330 = vmatprep.subr.bf16.mxu0 %v1511_v4 }
  0x7a   : > { %v646_v28 = vadd.f32 %v607_v18, %v606_v17  ;;  %v471_v29 = vadd.f32 %v432_v19, %v367_v11  ;;  %v536_v30 = vunpack.c.h.bf16 %v502_v55  ;;  %v371_v33 = vunpack.c.l.bf16 %v340_v16  ;;  %v507_v55 = vld [vmem:[%s1921_s14 + $0x30] sm:$0xff]  ;;  %v2024_v11 = vld [vmem:[%s1903_s21 + $0x50] ss:$12 sps:$4 sm:$0xff]  }
  0x7b   : > { %v1982_v36 = vadd.f32 %v534_v20, %v469_v23  ;;  %v1984_v37 = vadd.f32 %v535_v25, %v470_v24  ;;  %v372_v38 = vunpack.c.h.bf16 %v340_v16  ;;  %v373_v39 = vunpack.c.h.bf16 %v1973_v21  ;;  %v409_v18 = vld [vmem:[%s1910_s13 + $0x54] sm:$0xff]  ;;  %v2042_v24 = vld [vmem:[%s1910_s13 + $0x50] ss:$12 sps:$4 sm:$0xff]   ;;  %1404 = vmatpush3.bf16.msra.mxu1 %v1512_v12 }
  0x7c   : > { %v647_v42 = vadd.f32 %v646_v28, %v608_v22  ;;  %v1991_v44 = vadd.f32 %v536_v30, %v471_v29  ;;  %v436_v45 = vunpack.c.l.bf16 %v405_v27  ;;  %v437_v46 = vunpack.c.h.bf16 %v405_v27  ;;  %v1513_v19 = vld [vmem:[%s2377_s3 + $0x8] sm:$0xff]   ;;  %v1514_v27 = vld [vmem:[%s2377_s3 + $0x50] sm:$0xff]   ;;  %1405 = vmatprep.subr.bf16.mxu1 %v1693_v0 }
  0x7d   : > { %v612_v51 = vmul.f32 %v1982_v36, %v1982_v36  ;;  %v613_v52 = vmul.f32 %v1984_v37, %v1984_v37  ;;  %v438_v53 = vunpack.c.h.bf16 %v1979_v34  ;;  %v540_v54 = vunpack.c.l.bf16 %v509_v35  ;;  %v513_v25 = vld [vmem:[%s1921_s14 + $0x54] sm:$0xff]  ;;  %1331 = vmatpush3.bf16.msra.mxu0 %v1513_v19 }
  0x7e   : > { %648 = vadd.xlane.f32.xlu0 %v647_v42  ;;  %v614_v57 = vmul.f32 %v1991_v44, %v1991_v44  ;;  %v475_v58 = vadd.f32 %v436_v45, %v371_v33  ;;  %v476_v59 = vadd.f32 %v437_v46, %v372_v38  ;;  %v541_v60 = vunpack.c.h.bf16 %v509_v35  ;;  %v2056_v42 = vld [vmem:[%s1921_s14 + $0x50] ss:$12 sps:$4 sm:$0xff]   ;;  %v1516_v46 = vld [vmem:[%s2377_s3 + $0x10] sm:$0xff]   ;;  %1332 = vmatprep.subr.bf16.mxu0 %v1514_v27 }
  0x7f   : > { %v654_v62 = vadd.f32 %v613_v52, %v612_v51  ;;  %v477_v63 = vadd.f32 %v438_v53, %v373_v39  ;;  %v542_v1 = vunpack.c.h.bf16 %v1988_v40  ;;  %v368_v2 = vunpack.c.l.bf16 %v338_v41  ;;  %v342_v45 = vld [vmem:[%s1903_s21 + $0x48] sm:$0xff] }
  0x80   : > { %v2018_v5 = vadd.f32 %v540_v54, %v475_v58  ;;  %v2020_v6 = vadd.f32 %v541_v60, %v476_v59  ;;  %v369_v7 = vunpack.c.h.bf16 %v338_v41  ;;  %v370_v10 = vunpack.c.l.bf16 %v1973_v21  ;;  %v1518_v58 = vld [vmem:[%s2377_s3 + $0x98] sm:$0xff]  }
  0x81   : > { %v655_v14 = vadd.f32 %v654_v62, %v614_v57  ;;  %v2030_v15 = vadd.f32 %v542_v1, %v477_v63  ;;  %v433_v16 = vunpack.c.l.bf16 %v403_v49  ;;  %v434_v17 = vunpack.c.h.bf16 %v403_v49  ;;  %v1517_v57 = vld [vmem:[%s2377_s3 + $0x58] sm:$0xff]   ;;  %1333 = vmatpush3.bf16.msra.mxu0 %v1516_v46 }
  0x82   : > { %v618_v20 = vmul.f32 %v2018_v5, %v2018_v5  ;;  %v619_v21 = vmul.f32 %v2020_v6, %v2020_v6  ;;  %v435_v22 = vunpack.c.l.bf16 %v1979_v34  ;;  %v537_v23 = vunpack.c.l.bf16 %v507_v55  ;;  %v1515_v34 = vld [vmem:[%s2377_s3 + $0x90] sm:$0xff]   ;;  %v1519_v1 = vld [vmem:[%s2377_s3 + $0x18] sm:$0xff]   ;;  %1334 = vmatprep.subr.bf16.mxu0 %v1517_v57  ;;  %v1521_v57 = vld [vmem:[%s2377_s3 + $0xa0] sm:$0xff]  }
  0x83   : > { %656 = vadd.xlane.f32.xlu1 %v655_v14  ;;  %v620_v28 = vmul.f32 %v2030_v15, %v2030_v15  ;;  %v472_v29 = vadd.f32 %v433_v16, %v368_v2  ;;  %v473_v30 = vadd.f32 %v434_v17, %v369_v7  ;;  %v538_v33 = vunpack.c.h.bf16 %v507_v55  ;;  %v511_v63 = vld [vmem:[%s1921_s14 + $0x48] sm:$0xff]  ;;  %1406 = vmatpush3.bf16.msra.mxu1 %v1515_v34  ;;  %v348_v17 = vld [vmem:[%s1903_s21 + $0x6c] sm:$0xff] }
  0x84   : > { %v662_v35 = vadd.f32 %v619_v21, %v618_v20  ;;  %v474_v38 = vadd.f32 %v435_v22, %v370_v10  ;;  %v539_v39 = vunpack.c.l.bf16 %v1988_v40  ;;  %v377_v41 = vunpack.c.l.bf16 %v2013_v3  ;;  %1407 = vmatprep.subr.bf16.mxu1 %v1693_v0  ;;  %v2098_v22 = vld [vmem:[%s1903_s21 + $0x68] ss:$12 sps:$4 sm:$0xff]  }
  0x85   : > { %v2063_v49 = vadd.f32 %v537_v23, %v472_v29  ;;  %v2065_v50 = vadd.f32 %v538_v33, %v473_v30  ;;  %v378_v40 = vunpack.c.h.bf16 %v2013_v3  ;;  %v379_v51 = vunpack.c.h.bf16 %v2024_v11  ;;  %v413_v29 = vld [vmem:[%s1910_s13 + $0x6c] sm:$0xff]  ;;  %1335 = vmatpush3.bf16.msra.mxu0 %v1519_v1 }
  0x86   : > { %v663_v52 = vadd.f32 %v662_v35, %v620_v28  ;;  %v2069_v53 = vadd.f32 %v539_v39, %v474_v38  ;;  %v442_v54 = vunpack.c.l.bf16 %v409_v18  ;;  %v443_v55 = vunpack.c.h.bf16 %v409_v18  ;;  %v2109_v35 = vld [vmem:[%s1910_s13 + $0x68] ss:$12 sps:$4 sm:$0xff]  }
  0x87   : > { %v615_v59 = vmul.f32 %v2063_v49, %v2063_v49  ;;  %v616_v60 = vmul.f32 %v2065_v50, %v2065_v50  ;;  %v444_v61 = vunpack.c.h.bf16 %v2042_v24  ;;  %v546_v62 = vunpack.c.l.bf16 %v513_v25  ;;  %1408 = vmatpush3.bf16.msra.mxu1 %v1518_v58  ;;  %v517_v38 = vld [vmem:[%s1921_s14 + $0x6c] sm:$0xff] }
  0x88   : > { %664 = vadd.xlane.f32.xlu1 %v663_v52  ;;  %v617_v2 = vmul.f32 %v2069_v53, %v2069_v53  ;;  %v481_v3 = vadd.f32 %v442_v54, %v377_v41  ;;  %v482_v4 = vadd.f32 %v443_v55, %v378_v40  ;;  %v547_v7 = vunpack.c.h.bf16 %v513_v25  ;;  %1409 = vmatprep.subr.bf16.mxu1 %v1693_v0  ;;  %v2117_v54 = vld [vmem:[%s1921_s14 + $0x68] ss:$12 sps:$4 sm:$0xff]  }
  0x89   : > { %v658_v10 = vadd.f32 %v616_v60, %v615_v59  ;;  %v483_v12 = vadd.f32 %v444_v61, %v379_v51  ;;  %v548_v14 = vunpack.c.h.bf16 %v2056_v42  ;;  %v374_v16 = vunpack.c.l.bf16 %v342_v45  ;;  %v346_v55 = vld [vmem:[%s1903_s21 + $0x60] sm:$0xff] }
  0x8a   : > { %v2092_v18 = vadd.f32 %v546_v62, %v481_v3  ;;  %v2094_v19 = vadd.f32 %v547_v7, %v482_v4  ;;  %v375_v20 = vunpack.c.h.bf16 %v342_v45  ;;  %v376_v21 = vunpack.c.l.bf16 %v2024_v11  ;;  %v1522_v58 = vld [vmem:[%s2377_s3 + $0x20] sm:$0xff]  }
  0x8b   : > { %v659_v23 = vadd.f32 %v658_v10, %v617_v2  ;;  %v2100_v25 = vadd.f32 %v548_v14, %v483_v12  ;;  %v439_v27 = vunpack.c.l.bf16 %v407_v56  ;;  %v440_v28 = vunpack.c.h.bf16 %v407_v56  ;;  %v1520_v56 = vld [vmem:[%s2377_s3 + $0x60] sm:$0xff]   ;;  %1410 = vmatpush3.bf16.msra.mxu1 %v1521_v57 }
  0x8c   : > { %v624_v30 = vmul.f32 %v2092_v18, %v2092_v18  ;;  %v625_v33 = vmul.f32 %v2094_v19, %v2094_v19  ;;  %v441_v34 = vunpack.c.l.bf16 %v2042_v24  ;;  %v543_v11 = vunpack.c.l.bf16 %v511_v63  ;;  %1336 = vmatprep.subr.bf16.mxu0 %v1520_v56  ;;  %1411 = vmatprep.subr.bf16.mxu1 %v1693_v0  ;;  %v1527_v56 = vld [vmem:[%s2377_s3 + $0xb0] sm:$0xff]  }
  0x8d   : > { %660 = vadd.xlane.f32.xlu0 %v659_v23  ;;  %v626_v39 = vmul.f32 %v2100_v25, %v2100_v25  ;;  %v478_v41 = vadd.f32 %v439_v27, %v374_v16  ;;  %v479_v45 = vadd.f32 %v440_v28, %v375_v20  ;;  %v544_v46 = vunpack.c.h.bf16 %v511_v63  ;;  %1337 = vmatpush3.bf16.msra.mxu0 %v1522_v58  ;;  %v411_v20 = vld [vmem:[%s1910_s13 + $0x60] sm:$0xff] }
  0x8e   : > { %v670_v40 = vadd.f32 %v625_v33, %v624_v30  ;;  %v480_v51 = vadd.f32 %v441_v34, %v376_v21  ;;  %v545_v52 = vunpack.c.l.bf16 %v2056_v42  ;;  %v383_v24 = vunpack.c.l.bf16 %v348_v17  ;;  %v515_v21 = vld [vmem:[%s1921_s14 + $0x60] sm:$0xff] }
  0x8f   : > { %v2129_v59 = vadd.f32 %v543_v11, %v478_v41  ;;  %v2131_v60 = vadd.f32 %v544_v46, %v479_v45  ;;  %v384_v42 = vunpack.c.h.bf16 %v348_v17  ;;  %v385_v61 = vunpack.c.h.bf16 %v2098_v22  ;;  %v1523_v30 = vld [vmem:[%s2377_s3 + $0x68] sm:$0xff]   ;;  %v1526_v45 = vld [vmem:[%s2377_s3 + $0x70] sm:$0xff]  }
  0x90   : > { %v671_v62 = vadd.f32 %v670_v40, %v626_v39  ;;  %v2134_v63 = vadd.f32 %v545_v52, %v480_v51  ;;  %v448_v1 = vunpack.c.l.bf16 %v413_v29  ;;  %v449_v2 = vunpack.c.h.bf16 %v413_v29  ;;  %v1524_v33 = vld [vmem:[%s2377_s3 + $0xa8] sm:$0xff]   ;;  %1338 = vmatprep.subr.bf16.mxu0 %v1523_v30 }
  0x91   : > { %v621_v3 = vmul.f32 %v2129_v59, %v2129_v59  ;;  %v622_v4 = vmul.f32 %v2131_v60, %v2131_v60  ;;  %v450_v7 = vunpack.c.h.bf16 %v2109_v35  ;;  %v552_v10 = vunpack.c.l.bf16 %v517_v38  ;;  %v1525_v34 = vld [vmem:[%s2377_s3 + $0x28] sm:$0xff]   ;;  %1412 = vmatpush3.bf16.msra.mxu1 %v1524_v33 }
  0x92   : > { %672 = vadd.xlane.f32.xlu1 %v671_v62  ;;  %v623_v12 = vmul.f32 %v2134_v63, %v2134_v63  ;;  %v487_v14 = vadd.f32 %v448_v1, %v383_v24  ;;  %v488_v16 = vadd.f32 %v449_v2, %v384_v42  ;;  %v553_v17 = vunpack.c.h.bf16 %v517_v38  ;;  %v352_v24 = vld [vmem:[%s1903_s21 + $0x84] sm:$0xff]  ;;  %v2176_v42 = vld [vmem:[%s1903_s21 + $0x80] ss:$12 sps:$4 sm:$0xff]   ;;  %1339 = vmatpush3.bf16.msra.mxu0 %v1525_v34  ;;  %v522_v34 = vld [vmem:[%s1921_s14 + $0x80] ss:$12 sps:$4 sm:$0xff]  }
  0x93   : > { %v666_v23 = vadd.f32 %v622_v4, %v621_v3  ;;  %v489_v27 = vadd.f32 %v450_v7, %v385_v61  ;;  %v554_v28 = vunpack.c.h.bf16 %v2117_v54  ;;  %v380_v29 = vunpack.c.l.bf16 %v346_v55  ;;  %1413 = vmatprep.subr.bf16.mxu1 %v1693_v0  ;;  %v1528_v61 = vld [vmem:[%s2377_s3 + $0x30] sm:$0xff]   ;;  %1340 = vmatprep.subr.bf16.mxu0 %v1526_v45  ;;  %v1529_v4 = vld [vmem:[%s2377_s3 + $0x78] sm:$0xff]  }
  0x94   : > { %v2156_v11 = vadd.f32 %v552_v10, %v487_v14  ;;  %v2158_v38 = vadd.f32 %v553_v17, %v488_v16  ;;  %v381_v39 = vunpack.c.h.bf16 %v346_v55  ;;  %v382_v41 = vunpack.c.l.bf16 %v2098_v22  ;;  %v418_v16 = vld [vmem:[%s1910_s13 + $0x80] ss:$12 sps:$4 sm:$0xff]  }
  0x95   : > { %v667_v46 = vadd.f32 %v666_v23, %v623_v12  ;;  %v2164_v40 = vadd.f32 %v554_v28, %v489_v27  ;;  %v445_v51 = vunpack.c.l.bf16 %v411_v20  ;;  %v446_v52 = vunpack.c.h.bf16 %v411_v20  ;;  %v521_v17 = vld [vmem:[%s1921_s14 + $0x84] sm:$0xff]  ;;  %1414 = vmatpush3.bf16.msra.mxu1 %v1527_v56 }
  0x96   : > { %v630_v22 = vmul.f32 %v2156_v11, %v2156_v11  ;;  %v631_v55 = vmul.f32 %v2158_v38, %v2158_v38  ;;  %v447_v57 = vunpack.c.l.bf16 %v2109_v35  ;;  %v549_v58 = vunpack.c.l.bf16 %v515_v21  ;;  %v417_v35 = vld [vmem:[%s1910_s13 + $0x84] sm:$0xff]  ;;  %1341 = vmatpush3.bf16.msra.mxu0 %v1528_v61  ;;  %1415 = vmatprep.subr.bf16.mxu1 %v1693_v0 }
  0x97   : > { %668 = vadd.xlane.f32.xlu0 %v667_v46  ;;  %v632_v62 = vmul.f32 %v2164_v40, %v2164_v40  ;;  %v484_v1 = vadd.f32 %v445_v51, %v380_v29  ;;  %v485_v2 = vadd.f32 %v446_v52, %v381_v39  ;;  %v550_v3 = vunpack.c.h.bf16 %v515_v21  ;;  %v1530_v28 = vld [vmem:[%s2377_s3 + $0xb8] sm:$0xff]   ;;  %1342 = vmatprep.subr.bf16.mxu0 %v1529_v4 }
  0x98   : > { %v678_v7 = vadd.f32 %v631_v55, %v630_v22  ;;  %v486_v10 = vadd.f32 %v447_v57, %v382_v41  ;;  %v551_v12 = vunpack.c.l.bf16 %v2117_v54  ;;  %v389_v14 = vunpack.c.l.bf16 %v352_v24  ;;  %v350_v39 = vld [vmem:[%s1903_s21 + $0x78] sm:$0xff]  ;;  %v415_v57 = vld [vmem:[%s1910_s13 + $0x78] sm:$0xff] }
  0x99   : > { %v2191_v20 = vadd.f32 %v549_v58, %v484_v1  ;;  %v2193_v23 = vadd.f32 %v550_v3, %v485_v2  ;;  %v390_v21 = vunpack.c.h.bf16 %v352_v24  ;;  %v391_v27 = vunpack.c.h.bf16 %v2176_v42  ;;  %v1531_v41 = vld [vmem:[%s2377_s3 + $0x38] sm:$0xff]   ;;  %v519_v2 = vld [vmem:[%s1921_s14 + $0x78] sm:$0xff]  ;;  %1416 = vmatpush3.bf16.msra.mxu1 %v1530_v28 }
  0x9a   : > { %v679_v29 = vadd.f32 %v678_v7, %v632_v62  ;;  %v2199_v30 = vadd.f32 %v551_v12, %v486_v10  ;;  %v454_v33 = vunpack.c.l.bf16 %v417_v35  ;;  %v455_v54 = vunpack.c.h.bf16 %v417_v35  ;;  %1343 = vmatpush3.bf16.msra.mxu0 %v1531_v41 }
  0x9b   : > { %v627_v45 = vmul.f32 %v2191_v20, %v2191_v20  ;;  %v628_v46 = vmul.f32 %v2193_v23, %v2193_v23  ;;  %v456_v51 = vunpack.c.h.bf16 %v418_v16  ;;  %v558_v52 = vunpack.c.l.bf16 %v521_v17 }
  0x9c   : > { %680 = vadd.xlane.f32.xlu1 %v679_v29  ;;  %v629_v24 = vmul.f32 %v2199_v30, %v2199_v30  ;;  %v493_v56 = vadd.f32 %v454_v33, %v389_v14  ;;  %v494_v22 = vadd.f32 %v455_v54, %v390_v21  ;;  %v559_v55 = vunpack.c.h.bf16 %v521_v17  ;;  %v354_v21 = vld [vmem:[%s1903_s21 + $0x90] sm:$0xff]  ;;  %v355_v54 = vld [vmem:[%s1903_s21 + $0x98] sm:$0xf]  ;;  %s323_s21 = smul.u32 13, %s1744_s22 }
  0x9d   : > { %v674_v58 = vadd.f32 %v628_v46, %v627_v45  ;;  %v495_v61 = vadd.f32 %v456_v51, %v391_v27  ;;  %v560_v62 = vunpack.c.h.bf16 %v522_v34  ;;  %v386_v1 = vunpack.c.l.bf16 %v350_v39  ;;  %v419_v46 = vld [vmem:[%s1910_s13 + $0x90] sm:$0xff] }
  0x9e   : > { %v2215_v3 = vadd.f32 %v558_v52, %v493_v56  ;;  %v2217_v35 = vadd.f32 %v559_v55, %v494_v22  ;;  %v387_v4 = vunpack.c.h.bf16 %v350_v39  ;;  %v388_v7 = vunpack.c.l.bf16 %v2176_v42  ;;  %v420_v22 = vld [vmem:[%s1910_s13 + $0x98] sm:$0xf]  ;;  %v523_v55 = vld [vmem:[%s1921_s14 + $0x90] sm:$0xff]  ;;  %p324_p8 = scmp.lt.s32.totalorder %s323_s21, 25 }
  0x9f   : > { %v675_v10 = vadd.f32 %v674_v58, %v629_v24  ;;  %v2220_v12 = vadd.f32 %v560_v62, %v495_v61  ;;  %v451_v14 = vunpack.c.l.bf16 %v415_v57  ;;  %v452_v17 = vunpack.c.h.bf16 %v415_v57 }
  0xa0   : > { %v636_v27 = vmul.f32 %v2215_v3, %v2215_v3  ;;  %v637_v28 = vmul.f32 %v2217_v35, %v2217_v35  ;;  %v453_v29 = vunpack.c.l.bf16 %v418_v16  ;;  %v555_v33 = vunpack.c.l.bf16 %v519_v2  ;;  %s2393_s21 = smov (!%p324_p8, %s323_s21), 25 }
  0xa1   : > { %676 = vadd.xlane.f32.xlu0 %v675_v10  ;;  %v638_v42 = vmul.f32 %v2220_v12, %v2220_v12  ;;  %v490_v39 = vadd.f32 %v451_v14, %v386_v1  ;;  %v491_v41 = vadd.f32 %v452_v17, %v387_v4  ;;  %v556_v45 = vunpack.c.h.bf16 %v519_v2  ;;  %v524_v2 = vld [vmem:[%s1921_s14 + $0x98] sm:$0xf]  ;;  %s1300_s7 = sshll.u32 %s2393_s21, 3 }
  0xa2   : > { %v686_v51 = vadd.f32 %v637_v28, %v636_v27  ;;  %v492_v52 = vadd.f32 %v453_v29, %v388_v7  ;;  %v557_v24 = vunpack.c.l.bf16 %v522_v34  ;;  %v392_v56 = vunpack.c.l.bf16 %v354_v21  ;;  %s2322_s24 = scalar_lea.vmem %s2379_s5, %s1300_s7 }
  0xa3   : > { %v2233_v57 = vadd.f32 %v555_v33, %v490_v39  ;;  %v2235_v16 = vadd.f32 %v556_v45, %v491_v41  ;;  %v393_v58 = vunpack.c.h.bf16 %v354_v21  ;;  %v394_v61 = vunpack.c.l.bf16 %v355_v54 }
  0xa4   : > { %v687_v62 = vadd.f32 %v686_v51, %v638_v42  ;;  %v2237_v10 = vadd.f32 %v557_v24, %v492_v52  ;;  %v457_v1 = vunpack.c.l.bf16 %v419_v46  ;;  %v458_v4 = vunpack.c.h.bf16 %v419_v46 }
  0xa5   : > { %v633_v14 = vmul.f32 %v2233_v57, %v2233_v57  ;;  %v634_v34 = vmul.f32 %v2235_v16, %v2235_v16  ;;  %v459_v7 = vunpack.c.l.bf16 %v420_v22  ;;  %v561_v17 = vunpack.c.l.bf16 %v523_v55 }
  0xa6   : > { %688 = vadd.xlane.f32.xlu1 %v687_v62  ;;  %v635_v27 = vmul.f32 %v2237_v10, %v2237_v10  ;;  %v496_v21 = vadd.f32 %v457_v1, %v392_v56  ;;  %v497_v28 = vadd.f32 %v458_v4, %v393_v58  ;;  %v562_v29 = vunpack.c.h.bf16 %v523_v55 }
  0xa7   : > { %v682_v33 = vadd.f32 %v634_v34, %v633_v14  ;;  %v498_v54 = vadd.f32 %v459_v7, %v394_v61  ;;  %v563_v42 = vunpack.c.l.bf16 %v524_v2  ;;  %vm1168_vm1 = vcmask 523264  }
  0xa8   : > { %v2246_v39 = vadd.f32 %v561_v17, %v496_v21  ;;  %v2248_v41 = vadd.f32 %v562_v29, %v497_v28 }
  0xa9   : > { %v683_v45 = vadd.f32 %v682_v33, %v635_v27  ;;  %v2252_v46 = vadd.f32 %v563_v42, %v498_v54 }
  0xaa   : > { %v639_v51 = vmul.f32 %v2246_v39, %v2246_v39  ;;  %v640_v52 = vmul.f32 %v2248_v41, %v2248_v41 }
  0xab   : > { %684 = vadd.xlane.f32.xlu0 %v683_v45  ;;  %v641_v24 = vmul.f32 %v2252_v46, %v2252_v46 }
  0xac   : > { %v690_v56 = vadd.f32 %v640_v52, %v639_v51 }
  0xae   : > { %v691_v22 = vadd.f32 %v690_v56, %v641_v24 }
  0xb0   : > { %692 = vadd.xlane.f32.xlu0 %v691_v22 }
 0x103   : > { %v645_v55 = vpop.xlane.xlu0 %644 }
 0x104   : > { %v694_v58 = vmax.f32 %v645_v55, 1e-24 }
 0x106   : > { %v653_v61 = vpop.xlane.xlu1 %652  ;;  %1532 = vrsqrt.f32 %v694_v58 }
 0x107   : > { %v696_v62 = vmax.f32 %v653_v61, 1e-24 }
 0x10b   : > { %v649_v1 = vpop.xlane.xlu0 %648 }
 0x10c   : > { %v695_v4 = vmax.f32 %v649_v1, 1e-24 }
 0x10e   : > { %1534 = vrsqrt.f32 %v695_v4 }
 0x10f   : > { %1536 = vrsqrt.f32 %v696_v62 }
 0x110   : > { %v657_v2 = vpop.xlane.xlu1 %656  ;;  %v1533_v34 = vpop.eup %1532 }
 0x111   : > { %v697_v14 = vmax.f32 %v657_v2, 1e-24  ;;  %v721_v21 = vmul.f32 %v1533_v34, %v1931_v31  ;;  %v722_v28 = vmul.f32 %v1533_v34, %v1933_v32  ;;  %v720_v29 = vmul.f32 %v1533_v34, %v1928_v26 }
 0x113   : > { %1538 = vrsqrt.f32 %v697_v14 }
 0x115   : > { %v665_v7 = vpop.xlane.xlu1 %664 }
 0x116   : > { %v699_v17 = vmax.f32 %v665_v7, 1e-24 }
 0x118   : > { %v1535_v27 = vpop.eup %1534  ;;  %1540 = vrsqrt.f32 %v699_v17 }
 0x119   : > { %v1537_v33 = vpop.eup %1536  ;;  %v724_v54 = vmul.f32 %v1535_v27, %v1963_v9  ;;  %v725_v42 = vmul.f32 %v1535_v27, %v1965_v13  ;;  %v723_v45 = vmul.f32 %v1535_v27, %v1961_v8 }
 0x11a   : > { %v661_v51 = vpop.xlane.xlu0 %660  ;;  %v727_v55 = vmul.f32 %v1537_v33, %v1947_v47  ;;  %v728_v8 = vmul.f32 %v1537_v33, %v1949_v48  ;;  %v726_v61 = vmul.f32 %v1537_v33, %v1943_v43 }
 0x11b   : > { %v698_v52 = vmax.f32 %v661_v51, 1e-24  ;;  %v808_v24 = vpack.c.bf16 %v724_v54, %v721_v21  ;;  %v809_v56 = vpack.c.bf16 %v725_v42, %v722_v28  ;;  %v807_v22 = vpack.c.bf16 %v723_v45, %v720_v29 }
 0x11d   : > { %v1539_v31 = vpop.eup %1538  ;;  %1542 = vrsqrt.f32 %v698_v52  ;;  %1011 = vmatprep.mubr.bf16.mxu0 %v808_v24  ;;  %1418 = vmatmul.mubr.bf16.vlgmr.msra.gmra.mrb[0].mxu1 %v809_v56 }
 0x11e   : > { %1012 = vmatmul.mubr.bf16.vlgmr.msra.gmra.mrb[0].mxu0 %v807_v22  ;;  %v730_v26 = vmul.f32 %v1539_v31, %v1984_v37  ;;  %1421 = vmatprep.mubr.msk.bf16.mxu1 %vm1694_vm0, %v1693_v0  ;;  %v731_v9 = vmul.f32 %v1539_v31, %v1991_v44  ;;  %v729_v47 = vmul.f32 %v1539_v31, %v1982_v36 }
 0x11f   : > { %v673_v32 = vpop.xlane.xlu1 %672 }
 0x120   : > { %v811_v13 = vpack.c.bf16 %v730_v26, %v727_v55  ;;  %v701_v58 = vmax.f32 %v673_v32, 1e-24  ;;  %v812_v1 = vpack.c.bf16 %v731_v9, %v728_v8  ;;  %v810_v37 = vpack.c.bf16 %v729_v47, %v726_v61 }
 0x122   : > { %1019 = vmatprep.mubr.bf16.mxu0 %v811_v13  ;;  %v1541_v62 = vpop.eup %1540  ;;  %1544 = vrsqrt.f32 %v701_v58 }
 0x123   : > { %v736_v48 = vmul.f32 %v1541_v62, %v2020_v6  ;;  %v737_v44 = vmul.f32 %v1541_v62, %v2030_v15  ;;  %v735_v43 = vmul.f32 %v1541_v62, %v2018_v5 }
 0x124   : > { %v669_v4 = vpop.xlane.xlu0 %668 }
 0x125   : > { %v700_v2 = vmax.f32 %v669_v4, 1e-24  ;;  %1422 = vmatmul.mubr.bf16.gmra.mrb[4].mxu1 %v812_v1 }
 0x126   : > { %1020 = vmatmul.mubr.bf16.gmra.mrb[4].mxu0 %v810_v37  ;;  %1425 = vmatprep.mubr.msk.bf16.mxu1 %vm1694_vm0, %v1693_v0 }
 0x127   : > { %v1543_v14 = vpop.eup %1542  ;;  %1546 = vrsqrt.f32 %v700_v2 }
 0x128   : > { %v733_v36 = vmul.f32 %v1543_v14, %v2065_v50  ;;  %v734_v34 = vmul.f32 %v1543_v14, %v2069_v53  ;;  %v732_v7 = vmul.f32 %v1543_v14, %v2063_v49 }
 0x129   : > { %v681_v17 = vpop.xlane.xlu1 %680 }
 0x12a   : > { %v703_v27 = vmax.f32 %v681_v17, 1e-24  ;;  %v814_v21 = vpack.c.bf16 %v736_v48, %v733_v36  ;;  %v815_v28 = vpack.c.bf16 %v737_v44, %v734_v34  ;;  %v813_v29 = vpack.c.bf16 %v735_v43, %v732_v7 }
 0x12c   : > { %1027 = vmatprep.mubr.bf16.mxu0 %v814_v21  ;;  %v1545_v33 = vpop.eup %1544  ;;  %1548 = vrsqrt.f32 %v703_v27 }
 0x12d   : > { %1426 = vmatmul.mubr.bf16.gmra.mrb[8].mxu1 %v815_v28  ;;  %v742_v15 = vmul.f32 %v1545_v33, %v2094_v19  ;;  %v743_v50 = vmul.f32 %v1545_v33, %v2100_v25  ;;  %v741_v49 = vmul.f32 %v1545_v33, %v2092_v18 }
 0x12e   : > { %v677_v6 = vpop.xlane.xlu0 %676  ;;  %1028 = vmatmul.mubr.bf16.gmra.mrb[8].mxu0 %v813_v29  ;;  %1429 = vmatprep.mubr.msk.bf16.mxu1 %vm1694_vm0, %v1693_v0 }
 0x12f   : > { %v702_v5 = vmax.f32 %v677_v6, 1e-24 }
 0x131   : > { %v1547_v53 = vpop.eup %1546  ;;  %1550 = vrsqrt.f32 %v702_v5 }
 0x132   : > { %v739_v54 = vmul.f32 %v1547_v53, %v2131_v60  ;;  %v740_v42 = vmul.f32 %v1547_v53, %v2134_v63  ;;  %v738_v45 = vmul.f32 %v1547_v53, %v2129_v59 }
 0x133   : > { %v689_v51 = vpop.xlane.xlu1 %688 }
 0x134   : > { %v705_v52 = vmax.f32 %v689_v51, 1e-24  ;;  %v817_v24 = vpack.c.bf16 %v742_v15, %v739_v54  ;;  %v818_v56 = vpack.c.bf16 %v743_v50, %v740_v42  ;;  %v816_v22 = vpack.c.bf16 %v741_v49, %v738_v45 }
 0x136   : > { %1035 = vmatprep.mubr.bf16.mxu0 %v817_v24  ;;  %1430 = vmatmul.mubr.bf16.gmra.mrb[12].mxu1 %v818_v56  ;;  %v1549_v19 = vpop.eup %1548  ;;  %1552 = vrsqrt.f32 %v705_v52 }
 0x137   : > { %1036 = vmatmul.mubr.bf16.gmra.mrb[12].mxu0 %v816_v22  ;;  %1433 = vmatprep.mubr.msk.bf16.mxu1 %vm1694_vm0, %v1693_v0  ;;  %v748_v60 = vmul.f32 %v1549_v19, %v2158_v38  ;;  %v749_v63 = vmul.f32 %v1549_v19, %v2164_v40  ;;  %v747_v59 = vmul.f32 %v1549_v19, %v2156_v11 }
 0x138   : > { %v685_v18 = vpop.xlane.xlu0 %684 }
 0x139   : > { %v704_v25 = vmax.f32 %v685_v18, 1e-24 }
 0x13b   : > { %v1551_v55 = vpop.eup %1550  ;;  %1554 = vrsqrt.f32 %v704_v25 }
 0x13c   : > { %v745_v31 = vmul.f32 %v1551_v55, %v2193_v23  ;;  %v746_v26 = vmul.f32 %v1551_v55, %v2199_v30  ;;  %v744_v32 = vmul.f32 %v1551_v55, %v2191_v20 }
 0x13d   : > { %v693_v8 = vpop.xlane.xlu0 %692 }
 0x13e   : > { %v706_v9 = vmax.f32 %v693_v8, 1e-24  ;;  %v820_v13 = vpack.c.bf16 %v748_v60, %v745_v31  ;;  %v821_v58 = vpack.c.bf16 %v749_v63, %v746_v26  ;;  %v819_v61 = vpack.c.bf16 %v747_v59, %v744_v32 }
 0x140   : > { %1556 = vrsqrt.f32 %v706_v9  ;;  %1043 = vmatprep.mubr.bf16.mxu0 %v820_v13  ;;  %1434 = vmatmul.mubr.bf16.gmra.mrb[16].mxu1 %v821_v58  ;;  %v1553_v38 = vpop.eup %1552 }
 0x141   : > { %1044 = vmatmul.mubr.bf16.gmra.mrb[16].mxu0 %v819_v61  ;;  %1437 = vmatprep.mubr.msk.bf16.mxu1 %vm1694_vm0, %v1693_v0  ;;  %v754_v11 = vmul.f32 %v1553_v38, %v2217_v35  ;;  %v755_v40 = vmul.f32 %v1553_v38, %v2220_v12  ;;  %v753_v23 = vmul.f32 %v1553_v38, %v2215_v3 }
 0x145   : > { %v1555_v20 = vpop.eup %1554 }
 0x146   : > { %v751_v30 = vmul.f32 %v1555_v20, %v2235_v16  ;;  %v752_v47 = vmul.f32 %v1555_v20, %v2237_v10  ;;  %v750_v62 = vmul.f32 %v1555_v20, %v2233_v57 }
 0x148   : > { %v823_v1 = vpack.c.bf16 %v754_v11, %v751_v30  ;;  %v824_v4 = vpack.c.bf16 %v755_v40, %v752_v47  ;;  %v822_v37 = vpack.c.bf16 %v753_v23, %v750_v62 }
 0x14a   : > { %v1557_v2 = vpop.eup %1556  ;;  %1051 = vmatprep.mubr.bf16.mxu0 %v823_v1  ;;  %1438 = vmatmul.mubr.bf16.gmra.mrb[20].mxu1 %v824_v4 }
 0x14b   : > { %1052 = vmatmul.mubr.bf16.gmra.mrb[20].mxu0 %v822_v37  ;;  %1441 = vmatprep.mubr.msk.bf16.mxu1 %vm1694_vm0, %v1693_v0  ;;  %v757_v3 = vmul.f32 %v1557_v2, %v2248_v41  ;;  %v758_v35 = vmul.f32 %v1557_v2, %v2252_v46  ;;  %v756_v12 = vmul.f32 %v1557_v2, %v2246_v39  ;;  %v2315_v0 = vld [vmem:[%s2378_s4] ss:$0 sm:$0xff] }
 0x14d   : > { %v826_v16 = vpack.c.bf16 %v757_v3, %v757_v3  ;;  %v827_v10 = vpack.c.bf16 %v758_v35, %v758_v35  ;;  %v825_v57 = vpack.c.bf16 %v756_v12, %v756_v12 }
 0x14f   : > { %1059 = vmatprep.mubr.bf16.mxu0 %v826_v16 }
 0x152   : > { %1442 = vmatmul.mubr.bf16.gmra.mrb[24].mxu1 %v827_v10 }
 0x153   : > { %1060 = vmatmul.mubr.bf16.gmra.mrb[24].mxu0 %v825_v57 }
 0x1f0   : > { %v1101_v48 = vpop.f32.mrb[0].mxu1 }
 0x1f1   : > { %v1344_v44 = vpop.f32.mrb[0].mxu0  ;;  %v1419_v43 = vpop.f32.mrb[1].mxu1 }
 0x1f2   : > { %v1345_v41 = vpop.f32.mrb[1].mxu0  ;;  %v1104_v46 = vpop.f32.mrb[2].mxu1 }
 0x1f3   : > { %v1346_v39 = vadd.f32 %v1345_v41, %v1344_v44  ;;  %v1347_v14 = vpop.f32.mrb[2].mxu0  ;;  %v1420_v36 = vpop.f32.mrb[3].mxu1 }
 0x1f4   : > { %v1348_v34 = vpop.f32.mrb[3].mxu0 }
 0x1f5   : > { %v1014_v7 = vadd.f32 %v1346_v39, %v2315_v0  ;;  %v1349_v17 = vadd.f32 %v1348_v34, %v1347_v14 }
 0x1f7   : > { %v1102_v27 = vadd.f32 %v1101_v48, %v1014_v7  ;;  %v1017_v21 = vadd.f32 %v1349_v17, %v2315_v0 }
 0x1f8   : > { %v1109_v28 = vpop.f32.mrb[4].mxu1 }
 0x1f9   : > { %v1155_v29 = vmax.f32 %v1102_v27, 0.0  ;;  %v1105_v33 = vadd.f32 %v1104_v46, %v1017_v21  ;;  %v1350_v6 = vpop.f32.mrb[4].mxu0  ;;  %v1423_v5 = vpop.f32.mrb[5].mxu1 }
 0x1fa   : > { %v1351_v15 = vpop.f32.mrb[5].mxu0  ;;  %v1112_v50 = vpop.f32.mrb[6].mxu1 }
 0x1fb   : > { %1169 = vst.msk [vmem:[%s2322_s24] sm:$0xff] %vm1168_vm1, %v1155_v29  ;;  %v1156_v49 = vmax.f32 %v1105_v33, 0.0  ;;  %v1352_v53 = vadd.f32 %v1351_v15, %v1350_v6  ;;  %v1353_v54 = vpop.f32.mrb[6].mxu0  ;;  %v1424_v42 = vpop.f32.mrb[7].mxu1 }
 0x1fc   : > { %v1354_v45 = vpop.f32.mrb[7].mxu0 }
 0x1fd   : > { %1170 = vst.msk [vmem:[%s2322_s24 + $0x8] sm:$0xff] %vm1168_vm1, %v1156_v49  ;;  %v1022_v51 = vadd.f32 %v1352_v53, %v2315_v0  ;;  %v1355_v52 = vadd.f32 %v1354_v45, %v1353_v54 }
 0x1ff   : > { %v1110_v24 = vadd.f32 %v1109_v28, %v1022_v51  ;;  %v1025_v56 = vadd.f32 %v1355_v52, %v2315_v0 }
 0x200   : > { %v1117_v22 = vpop.f32.mrb[8].mxu1 }
 0x201   : > { %v1157_v19 = vmax.f32 %v1110_v24, 0.0  ;;  %v1113_v18 = vadd.f32 %v1112_v50, %v1025_v56  ;;  %v1356_v25 = vpop.f32.mrb[8].mxu0  ;;  %v1427_v60 = vpop.f32.mrb[9].mxu1 }
 0x202   : > { %v1357_v63 = vpop.f32.mrb[9].mxu0  ;;  %v1120_v59 = vpop.f32.mrb[10].mxu1 }
 0x203   : > { %1171 = vst.msk [vmem:[%s2322_s24 + $0x10] sm:$0xff] %vm1168_vm1, %v1157_v19  ;;  %v1158_v55 = vmax.f32 %v1113_v18, 0.0  ;;  %v1358_v31 = vadd.f32 %v1357_v63, %v1356_v25  ;;  %v1359_v26 = vpop.f32.mrb[10].mxu0  ;;  %v1428_v32 = vpop.f32.mrb[11].mxu1 }
 0x204   : > { %v1360_v8 = vpop.f32.mrb[11].mxu0 }
 0x205   : > { %1172 = vst.msk [vmem:[%s2322_s24 + $0x18] sm:$0xff] %vm1168_vm1, %v1158_v55  ;;  %v1030_v9 = vadd.f32 %v1358_v31, %v2315_v0  ;;  %v1361_v13 = vadd.f32 %v1360_v8, %v1359_v26 }
 0x207   : > { %v1118_v58 = vadd.f32 %v1117_v22, %v1030_v9  ;;  %v1033_v61 = vadd.f32 %v1361_v13, %v2315_v0 }
 0x209   : > { %v1159_v38 = vmax.f32 %v1118_v58, 0.0  ;;  %v1121_v11 = vadd.f32 %v1120_v59, %v1033_v61  ;;  %v1125_v40 = vpop.f32.mrb[12].mxu1 }
 0x20a   : > { %v1362_v23 = vpop.f32.mrb[12].mxu0  ;;  %v1431_v20 = vpop.f32.mrb[13].mxu1 }
 0x20b   : > { %1173 = vst.msk [vmem:[%s2322_s24 + $0x20] sm:$0xff] %vm1168_vm1, %v1159_v38  ;;  %v1160_v30 = vmax.f32 %v1121_v11, 0.0  ;;  %v1363_v47 = vpop.f32.mrb[13].mxu0  ;;  %v1128_v62 = vpop.f32.mrb[14].mxu1 }
 0x20c   : > { %v1364_v1 = vadd.f32 %v1363_v47, %v1362_v23  ;;  %v1365_v4 = vpop.f32.mrb[14].mxu0  ;;  %v1432_v37 = vpop.f32.mrb[15].mxu1 }
 0x20d   : > { %1174 = vst.msk [vmem:[%s2322_s24 + $0x28] sm:$0xff] %vm1168_vm1, %v1160_v30  ;;  %v1366_v2 = vpop.f32.mrb[15].mxu0 }
 0x20e   : > { %v1038_v3 = vadd.f32 %v1364_v1, %v2315_v0  ;;  %v1367_v35 = vadd.f32 %v1366_v2, %v1365_v4 }
 0x210   : > { %v1126_v12 = vadd.f32 %v1125_v40, %v1038_v3  ;;  %v1041_v16 = vadd.f32 %v1367_v35, %v2315_v0 }
 0x212   : > { %v1161_v10 = vmax.f32 %v1126_v12, 0.0  ;;  %v1129_v57 = vadd.f32 %v1128_v62, %v1041_v16 }
 0x213   : > { %v1133_v48 = vpop.f32.mrb[16].mxu1 }
 0x214   : > { %1175 = vst.msk [vmem:[%s2322_s24 + $0x30] sm:$0xff] %vm1168_vm1, %v1161_v10  ;;  %v1162_v44 = vmax.f32 %v1129_v57, 0.0  ;;  %v1368_v43 = vpop.f32.mrb[16].mxu0  ;;  %v1435_v41 = vpop.f32.mrb[17].mxu1 }
 0x215   : > { %v1369_v46 = vpop.f32.mrb[17].mxu0  ;;  %v1136_v39 = vpop.f32.mrb[18].mxu1 }
 0x216   : > { %1176 = vst.msk [vmem:[%s2322_s24 + $0x38] sm:$0xff] %vm1168_vm1, %v1162_v44  ;;  %v1370_v14 = vadd.f32 %v1369_v46, %v1368_v43  ;;  %v1371_v36 = vpop.f32.mrb[18].mxu0  ;;  %v1436_v34 = vpop.f32.mrb[19].mxu1 }
 0x217   : > { %v1372_v7 = vpop.f32.mrb[19].mxu0 }
 0x218   : > { %v1046_v17 = vadd.f32 %v1370_v14, %v2315_v0  ;;  %v1373_v27 = vadd.f32 %v1372_v7, %v1371_v36 }
 0x21a   : > { %v1134_v21 = vadd.f32 %v1133_v48, %v1046_v17  ;;  %v1049_v28 = vadd.f32 %v1373_v27, %v2315_v0 }
 0x21c   : > { %v1163_v29 = vmax.f32 %v1134_v21, 0.0  ;;  %v1137_v33 = vadd.f32 %v1136_v39, %v1049_v28 }
 0x21d   : > { %v1141_v6 = vpop.f32.mrb[20].mxu1 }
 0x21e   : > { %1177 = vst.msk [vmem:[%s2322_s24 + $0x40] sm:$0xff] %vm1168_vm1, %v1163_v29  ;;  %v1164_v5 = vmax.f32 %v1137_v33, 0.0  ;;  %v1374_v15 = vpop.f32.mrb[20].mxu0  ;;  %v1439_v50 = vpop.f32.mrb[21].mxu1 }
 0x21f   : > { %v1375_v49 = vpop.f32.mrb[21].mxu0  ;;  %v1144_v53 = vpop.f32.mrb[22].mxu1 }
 0x220   : > { %1178 = vst.msk [vmem:[%s2322_s24 + $0x48] sm:$0xff] %vm1168_vm1, %v1164_v5  ;;  %v1376_v54 = vadd.f32 %v1375_v49, %v1374_v15  ;;  %v1377_v42 = vpop.f32.mrb[22].mxu0  ;;  %v1440_v45 = vpop.f32.mrb[23].mxu1 }
 0x221   : > { %v1378_v51 = vpop.f32.mrb[23].mxu0 }
 0x222   : > { %v1054_v52 = vadd.f32 %v1376_v54, %v2315_v0  ;;  %v1379_v24 = vadd.f32 %v1378_v51, %v1377_v42 }
 0x224   : > { %v1142_v56 = vadd.f32 %v1141_v6, %v1054_v52  ;;  %v1057_v22 = vadd.f32 %v1379_v24, %v2315_v0 }
 0x225   : > { %v1149_v19 = vpop.f32.mrb[24].mxu1 }
 0x226   : > { %v1165_v18 = vmax.f32 %v1142_v56, 0.0  ;;  %v1145_v25 = vadd.f32 %v1144_v53, %v1057_v22  ;;  %v1380_v60 = vpop.f32.mrb[24].mxu0  ;;  %v1443_v63 = vpop.f32.mrb[25].mxu1 }
 0x227   : > { %v1381_v59 = vpop.f32.mrb[25].mxu0  ;;  %v1152_v55 = vpop.f32.mrb[26].mxu1 }
 0x228   : > { %1179 = vst.msk [vmem:[%s2322_s24 + $0x50] sm:$0xff] %vm1168_vm1, %v1165_v18  ;;  %v1166_v31 = vmax.f32 %v1145_v25, 0.0  ;;  %v1382_v26 = vadd.f32 %v1381_v59, %v1380_v60  ;;  %v1383_v32 = vpop.f32.mrb[26].mxu0  ;;  %v1444_v8 = vpop.f32.mrb[27].mxu1 }
 0x229   : > { %v1384_v9 = vpop.f32.mrb[27].mxu0 }
 0x22a   : > { %1180 = vst.msk [vmem:[%s2322_s24 + $0x58] sm:$0xff] %vm1168_vm1, %v1166_v31  ;;  %v1062_v13 = vadd.f32 %v1382_v26, %v2315_v0 }
 0x22c   : > { %v1150_v58 = vadd.f32 %v1149_v19, %v1062_v13 }
 0x22e   : > { %v1167_v61 = vmax.f32 %v1150_v58, 0.0 }
 0x230   : > { %1181 = vst.msk [vmem:[%s2322_s24 + $0x60] sm:$0xff] %vm1168_vm1, %v1167_v61 }
 0x231 PF: > { %p18_p1 = scmp.ge.s32.totalorder %s1747_s23, 4   ;;  %s2388_s18 = smov %s1678_s19 }
 0x232   : > { %s2389_s19 = smov %s1682_s20  ;;  %s2390_s20 = smov %s1757_s26 }
 0x233   : > { %s2391_s21 = smov %s1747_s23  ;;  %20 = sbr.rel (!%p18_p1) target bundleno = 5 (0x5), region = 104 }
 0x23a   :  { %1204 = vsyncpa [#allocation3], 1 }
 0x23b   :  { %1206 = vsyncpa [#allocation3 + $0x1], 1 }
 0x23c   :  { %1207 = vsyncpa [#allocation5], 1 }
 0x23d   :  { %1209 = vsyncpa [#allocation5 + $0x1], 1 }

</bundles_post_ra>
